<compile_context>
chip_gen: v5e
topology: v5e:2x2
jax: 0.10.0
libtpu: 0.0.40
codegen_flags: <defaults>
</compile_context>

<pallas_src>
import jax
import jax.numpy as jnp
from jax.experimental import pallas as pl
from jax.experimental.pallas import tpu as pltpu


def _reduction_kernel(x_ref, s_ref, rx_ref, rs_ref, b_ref, out_ref):
    """One row-tile of the fused reduction.

    x_ref, s_ref : (tm, n_low)        bf16   input tiles
    rx_ref       : (n_low, 2H+1)      bf16   [W_tau.T | 0 | W_tau.T @ a]
    rs_ref       : (n_low, 2H+1)      bf16   [0 | W_omega.T | 0]
    b_ref        : (1,)               f32    scalar bias (SMEM)
    out_ref      : (tm, 2H+1)         f32    packed [z | r | y]
    """
    # Two MXU passes (no transposes, f32 accumulation); y is just the last
    # column of the x pass, so no separate degenerate (tm, H) x (H, 1) matmul.
    acc = jnp.dot(x_ref[...], rx_ref[...], preferred_element_type=jnp.float32)
    acc = acc + jnp.dot(s_ref[...], rs_ref[...],
                        preferred_element_type=jnp.float32)

    # Add the mechanism bias b to the last (y) column only.
    w = out_ref.shape[-1]
    col = jax.lax.broadcasted_iota(jnp.int32, (1, w), 1)
    bias_row = jnp.where(col == w - 1, b_ref[0], jnp.float32(0.0))

    out_ref[...] = (acc + bias_row).astype(out_ref.dtype)


def reduction_forward(x, s, w_tau, w_omega, a, b, *, tile_m=4096):
    """JAX wrapper around the Pallas kernel.

    x, s            : (batch, batch_sim, n_low)
    w_tau, w_omega  : (n_high, n_low)
    a               : (n_high,)   high-level mechanism coefficients
    b               : scalar      high-level mechanism bias
    Returns (z, r, y_hat) of shapes (batch, batch_sim, n_high) x2 and
    (batch, batch_sim, 1).
    """
    batch, batch_sim, n_low = x.shape
    n_high = w_tau.shape[0]
    M = batch * batch_sim
    W = 2 * n_high + 1

    in_dtype = jnp.bfloat16  # halve HBM read traffic; MXU-native on v5e/v6e/v7x
    x2d = x.reshape(M, n_low).astype(in_dtype)
    s2d = s.reshape(M, n_low).astype(in_dtype)

    # Build combined (pre-transposed) RHS matrices once in the wrapper:
    #   packed = x @ rhs_x + s @ rhs_s = [z | r | z @ a]
    wt_t = w_tau.astype(jnp.float32).T                      # (n_low, n_high)
    wo_t = w_omega.astype(jnp.float32).T                    # (n_low, n_high)
    w_y = wt_t @ a.astype(jnp.float32).reshape(n_high, 1)   # (n_low, 1)
    zeros_h = jnp.zeros((n_low, n_high), jnp.float32)
    zeros_1 = jnp.zeros((n_low, 1), jnp.float32)
    rhs_x = jnp.concatenate([wt_t, zeros_h, w_y], axis=1).astype(in_dtype)
    rhs_s = jnp.concatenate([zeros_h, wo_t, zeros_1], axis=1).astype(in_dtype)
    b_arr = jnp.asarray(b, jnp.float32).reshape(1,)

    # Row-tile size: big tiles amortize per-step overhead; at n_low=32 /
    # W=2H+1 lanes the double-buffered VMEM footprint stays well under the
    # scoped default (16 MiB v5e / 32 MiB v6e/v7x) even at tile_m=4096,
    # so no vmem_limit_bytes override is needed.
    m_aligned = ((M + 15) // 16) * 16          # keep 2nd-minor dim bf16-tile friendly
    tm = min(tile_m, m_aligned)
    grid_m = pl.cdiv(M, tm)                    # ragged last block: OOB rows are
                                               # row-local garbage, their writes
                                               # are dropped by Pallas.

    packed = pl.pallas_call(
        _reduction_kernel,
        out_shape=jax.ShapeDtypeStruct((M, W), jnp.float32),
        grid=(grid_m,),
        in_specs=[
            pl.BlockSpec((tm, n_low), lambda i: (i, 0)),     # x tile
            pl.BlockSpec((tm, n_low), lambda i: (i, 0)),     # s tile
            pl.BlockSpec((n_low, W), lambda i: (0, 0)),      # rhs_x (resident)
            pl.BlockSpec((n_low, W), lambda i: (0, 0)),      # rhs_s (resident)
            pl.BlockSpec(memory_space=pltpu.SMEM),           # b scalar
        ],
        out_specs=pl.BlockSpec((tm, W), lambda i: (i, 0)),   # packed [z|r|y]
        compiler_params=pltpu.CompilerParams(
            dimension_semantics=("parallel",),               # split M across TCs (v7x)
        ),
    )(x2d, s2d, rhs_x, rhs_s, b_arr)

    z = packed[:, :n_high].reshape(batch, batch_sim, n_high)
    r = packed[:, n_high:2 * n_high].reshape(batch, batch_sim, n_high)
    y_hat = packed[:, 2 * n_high:].reshape(batch, batch_sim, 1)
    return z, r, y_hat


if __name__ == "__main__":
    # Small shapes consistent with the module's forward:
    #   x, s : (batch_size, batch_size_sim, n_low)
    batch, batch_sim = 2, 8
    n_low, n_high = 32, 4

    key = jax.random.PRNGKey(0)
    kx, ks, kwt, kwo, ka, kb = jax.random.split(key, 6)

    x = jax.random.normal(kx, (batch, batch_sim, n_low), dtype=jnp.float32)
    s = jax.random.normal(ks, (batch, batch_sim, n_low), dtype=jnp.float32)

    # Deterministic parameter init (LinearReductionMap weights + high-level
    # causal-mechanism coefficients).
    w_tau = jax.random.normal(kwt, (n_high, n_low), dtype=jnp.float32) / jnp.sqrt(n_low)
    w_omega = jax.random.normal(kwo, (n_high, n_low), dtype=jnp.float32) / jnp.sqrt(n_low)
    a = jax.random.normal(ka, (n_high,), dtype=jnp.float32)
    b = jax.random.normal(kb, (), dtype=jnp.float32)

    z, r, y_hat = reduction_forward(x, s, w_tau, w_omega, a, b)
    jax.block_until_ready((z, r, y_hat))

    # Reference in plain f32 JAX (kernel uses bf16 inputs -> relaxed tolerance).
    z_ref = jnp.einsum("bsl,hl->bsh", x, w_tau)
    r_ref = jnp.einsum("bsl,hl->bsh", s, w_omega)
    y_ref = (z_ref @ a)[..., None] + b

    assert z.shape == (batch, batch_sim, n_high)
    assert r.shape == (batch, batch_sim, n_high)
    assert y_hat.shape == (batch, batch_sim, 1)
    assert jnp.allclose(z, z_ref, atol=3e-2, rtol=3e-2)
    assert jnp.allclose(r, r_ref, atol=3e-2, rtol=3e-2)
    assert jnp.allclose(y_hat, y_ref, atol=3e-2, rtol=3e-2)

    print("KERNEL_OK")
</pallas_src>

<mosaic_0001>
module attributes {stable_mosaic.version = 11 : i64} {
  func.func @_reduction_kernel(%arg0: i32, %arg1: memref<16x32xbf16, #tpu.memory_space<vmem>>, %arg2: memref<16x32xbf16, #tpu.memory_space<vmem>>, %arg3: memref<32x9xbf16, #tpu.memory_space<vmem>>, %arg4: memref<32x9xbf16, #tpu.memory_space<vmem>>, %arg5: memref<1xf32, #tpu.memory_space<smem>>, %arg6: memref<16x9xf32, #tpu.memory_space<vmem>>) attributes {dimension_semantics = [#tpu.dimension_semantics<parallel>], iteration_bounds = array<i64: 1>, scalar_prefetch = 0 : i64, scratch_operands = 0 : i64, tpu.core_type = #tpu.core_type<tc>, window_params = [{transform_indices = @transform_0, window_bounds = array<i64: 16, 32>}, {transform_indices = @transform_1, window_bounds = array<i64: 16, 32>}, {pipeline_mode = #tpu.pipeline_mode<synchronous>, transform_indices = @transform_2, window_bounds = array<i64: 32, 9>}, {pipeline_mode = #tpu.pipeline_mode<synchronous>, transform_indices = @transform_3, window_bounds = array<i64: 32, 9>}, {transform_indices = @transform_4, window_bounds = array<i64: 1>}, {transform_indices = @transform_5, window_bounds = array<i64: 16, 9>}]} {
    %c0 = arith.constant 0 : index
    %c0_0 = arith.constant 0 : index
    %0 = vector.load %arg1[%c0, %c0_0] : memref<16x32xbf16, #tpu.memory_space<vmem>>, vector<16x32xbf16>
    %c0_1 = arith.constant 0 : index
    %c0_2 = arith.constant 0 : index
    %1 = vector.load %arg3[%c0_1, %c0_2] : memref<32x9xbf16, #tpu.memory_space<vmem>>, vector<32x9xbf16>
    %cst = arith.constant dense<0.000000e+00> : vector<16x9xf32>
    %2 = tpu.matmul %0, %1, %cst {dimension_numbers = #tpu.dot_dimension_numbers<[1], [0], [0], [1], [0, 0, 1, 1], [], []>} : vector<16x32xbf16>, vector<32x9xbf16>, vector<16x9xf32> -> vector<16x9xf32>
    %c0_3 = arith.constant 0 : index
    %c0_4 = arith.constant 0 : index
    %3 = vector.load %arg2[%c0_3, %c0_4] : memref<16x32xbf16, #tpu.memory_space<vmem>>, vector<16x32xbf16>
    %c0_5 = arith.constant 0 : index
    %c0_6 = arith.constant 0 : index
    %4 = vector.load %arg4[%c0_5, %c0_6] : memref<32x9xbf16, #tpu.memory_space<vmem>>, vector<32x9xbf16>
    %cst_7 = arith.constant dense<0.000000e+00> : vector<16x9xf32>
    %5 = tpu.matmul %3, %4, %cst_7 {dimension_numbers = #tpu.dot_dimension_numbers<[1], [0], [0], [1], [0, 0, 1, 1], [], []>} : vector<16x32xbf16>, vector<32x9xbf16>, vector<16x9xf32> -> vector<16x9xf32>
    %6 = arith.addf %2, %5 : vector<16x9xf32>
    %7 = tpu.iota {dimensions = array<i32: 1>} : vector<1x9xi32>
    %c8_i32 = arith.constant 8 : i32
    %8 = vector.broadcast %c8_i32 : i32 to vector<1x9xi32>
    %9 = arith.cmpi eq, %7, %8 : vector<1x9xi32>
    %c0_8 = arith.constant 0 : index
    %10 = memref.load %arg5[%c0_8] : memref<1xf32, #tpu.memory_space<smem>>
    %cst_9 = arith.constant 0.000000e+00 : f32
    %11 = vector.broadcast %10 : f32 to vector<1x9xf32>
    %12 = vector.broadcast %cst_9 : f32 to vector<1x9xf32>
    %13 = arith.select %9, %11, %12 : vector<1x9xi1>, vector<1x9xf32>
    %14 = vector.broadcast %13 : vector<1x9xf32> to vector<16x9xf32>
    %15 = arith.addf %6, %14 : vector<16x9xf32>
    %c0_10 = arith.constant 0 : index
    %c0_11 = arith.constant 0 : index
    %16 = vector.load %arg6[%c0_10, %c0_11] : memref<16x9xf32, #tpu.memory_space<vmem>>, vector<16x9xf32>
    tpu.vector_store %arg6[%c0_10, %c0_11], %15 {strides = array<i32>} : memref<16x9xf32, #tpu.memory_space<vmem>>, vector<16x9xf32>,
    return
  }
  func.func @transform_0(%arg0: i32) -> (i32, i32) {
    %c0_i32 = arith.constant 0 : i32
    %c0_i32_0 = arith.constant 0 : i32
    return %arg0, %c0_i32 : i32, i32
  }
  func.func @transform_1(%arg0: i32) -> (i32, i32) {
    %c0_i32 = arith.constant 0 : i32
    %c0_i32_0 = arith.constant 0 : i32
    return %arg0, %c0_i32 : i32, i32
  }
  func.func @transform_2(%arg0: i32) -> (i32, i32) {
    %c0_i32 = arith.constant 0 : i32
    %c0_i32_0 = arith.constant 0 : i32
    %c0_i32_1 = arith.constant 0 : i32
    return %c0_i32, %c0_i32_0 : i32, i32
  }
  func.func @transform_3(%arg0: i32) -> (i32, i32) {
    %c0_i32 = arith.constant 0 : i32
    %c0_i32_0 = arith.constant 0 : i32
    %c0_i32_1 = arith.constant 0 : i32
    return %c0_i32, %c0_i32_0 : i32, i32
  }
  func.func @transform_4(%arg0: i32) -> i32 {
    %c0_i32 = arith.constant 0 : i32
    %c0_i32_0 = arith.constant 0 : i32
    return %c0_i32 : i32
  }
  func.func @transform_5(%arg0: i32) -> (i32, i32) {
    %c0_i32 = arith.constant 0 : i32
    %c0_i32_0 = arith.constant 0 : i32
    return %arg0, %c0_i32 : i32, i32
  }
}

</mosaic_0001>

<bundles_post_ra>
// kernel: tpu_custom_call.1
= control target key start
LH: loop header
LB: loop body
LE: loop exit
PB: predicated region body
PF: predicated region fallthrough
CT: control target
= control target key end

     0   :  { %s251_s0 = inlined_call_operand.vmem [shape: bf16[16,32], index: 0, kind: input, shape index: {}]   ;;  %s252_s1 = inlined_call_operand.vmem [shape: bf16[16,32], index: 1, kind: input, shape index: {}]   ;;  %s253_s2 = inlined_call_operand.vmem [shape: bf16[32,9], index: 2, kind: input, shape index: {}]   ;;  %s254_s3 = inlined_call_operand.vmem [shape: bf16[32,9], index: 3, kind: input, shape index: {}]   ;;  %s255_s4 = inlined_call_operand.<no memory space> [shape: f32[1], index: 4, kind: input, shape index: {}]   ;;  %s256_s5 = inlined_call_operand.hbm [shape: f32[16,9], index: 5, kind: output, shape index: {}]  }
   0x1   :  { %v164_v0 = vld [vmem:[%s254_s3 + $0x8] sm:$0xff]  ;;  %v163_v2 = vld [vmem:[%s254_s3] sm:$0xff] }
   0x2   :  { %v161_v1 = vld [vmem:[%s253_s2 + $0x8] sm:$0xff]  ;;  %62 = vmatpush.bf16.msra.mxu0 %v164_v0  ;;  %v160_v3 = vld [vmem:[%s253_s2] sm:$0xff] }
   0x3   :  { %96 = vmatpush.bf16.msra.mxu1 %v161_v1 }
   0x4   :  { %11 = vsyncpa [#allocation4], 0  ;;  %v162_v4 = vld [vmem:[%s252_s1] sm:$0xff]  ;;  %vm52_vm0 = vcmask 261120   ;;  %v104_v6 = vlaneseq  ;;  %v108_v8 = vstv %s255_s4  ;;  %vm112_vm2 = vcmask 72704   ;;  %s121_s7 = sshll.u32 %s256_s5, 4  ;;  %s122_s7 = int_to_ptr.hbm [resolvable:$true] %s121_s7 }
   0x5   :  { %v159_v5 = vld [vmem:[%s251_s0] sm:$0xff]  ;;  %s194_s0 = smov [#allocation3]   ;;  %s195_s4 = smov 128  }
   0x6   :  { %63 = vmatpush.bf16.msra.mxu0 %v163_v2  ;;  %v105_v7 = vand.u32 127, %v104_v6  ;;  %s119_s1 = sshll.u32 %s194_s0, 4  ;;  %s196_s8 = smov 8   ;;  %s120_s1 = int_to_ptr.vmem [resolvable:$true] %s119_s1 }
   0x7   :  { %97 = vmatpush.bf16.msra.mxu1 %v160_v3 }
   0x8   :  { %vm106_vm1 = vcmp.eq.s32.totalorder %v105_v7, 8 }
   0x9   :  { %145 = vmatmul.msk.bf16.vlgmr.msra.gmra.mxu0 %vm52_vm0, %v162_v4  ;;  %v109_v11 = vsel %vm106_vm1, %v108_v8, 0.0 }
   0xa   :  { %158 = vmatmul.msk.bf16.vlgmr.msra.gmra.mxu1 %vm52_vm0, %v159_v5 }
  0x86   :  { %v65_v9 = vpop.f32.mrf.mxu0 }
  0x87   :  { %v99_v10 = vpop.f32.mrf.mxu1 }
  0x88   :  { %v100_v12 = vadd.f32 %v99_v10, %v65_v9 }
  0x8a   :  { %v110_v13 = vadd.f32 %v109_v11, %v100_v12 }
  0x8c   :  { %113 = vst.msk [vmem:[#allocation3] sm:$0xff] %vm112_vm2, %v110_v13 }
  0x8e   :  { %v67_v14 = vpop.f32.mrf.mxu0 }
  0x8f   :  { %v101_v15 = vpop.f32.mrf.mxu1 }
  0x90   :  { %v102_v16 = vadd.f32 %v101_v15, %v67_v14 }
  0x92   :  { %v111_v17 = vadd.f32 %v109_v11, %v102_v16 }
  0x94   :  { %114 = vst.msk [vmem:[#allocation3 + $0x8] sm:$0xff] %vm112_vm2, %v111_v17 }
  0x95   :  { %127 = dma.vmem_to_hbm [thread:$0]  %s120_s1, 256, %s122_s7, [#allocation4], %s195_s4, %s195_s4, %s196_s8  }
  0x96   :  { %192 = dma.done.wait [#allocation4], 256  }
  0x97   :  { %193 = vsyncadd [#allocation4], 4294967040 }
  0x98   :  { %132 = vsyncpa [#allocation4], 1 }

</bundles_post_ra>
